<compile_context>
chip_gen: v7x
topology: tpu7x:2x2x1
jax: 0.10.0
libtpu: 0.0.40
codegen_flags: <defaults>
</compile_context>

<pallas_src>
from functools import partial

import jax
import jax.numpy as jnp
from jax.experimental import pallas as pl
from jax.experimental.pallas import tpu as pltpu


def _proj_bias_kernel(x_ref, w_ref, b_ref, o_ref):
    # x_ref: (TB, P)   pooled patch features
    # w_ref: (P, TD)   projection weight slice (torch weight.T, D zero-padded)
    # b_ref: (1, TD)   bias slice
    # o_ref: (TB, TD)  sublane/lane-dense output block
    acc = jnp.dot(x_ref[...], w_ref[...], preferred_element_type=jnp.float32)
    o_ref[...] = (acc + b_ref[...]).astype(o_ref.dtype)


def _round_up(x, m):
    return (x + m - 1) // m * m


def _pick_batch_tile(Bp):
    # Largest multiple of 8 that divides Bp, capped at 256 (v5e MXU is 128-row,
    # v6e/v7x are 256-row; 256 keeps VMEM pressure modest on all generations).
    if Bp <= 256:
        return Bp
    return max(t for t in range(8, 257, 8) if Bp % t == 0)


def _pick_embed_tile(Dp):
    # Largest multiple of 128 dividing Dp, capped at 512; prefer >= 2 tiles so
    # a "parallel" grid axis can shard across both v7x TensorCores.
    candidates = [t for t in range(128, min(Dp, 512) + 1, 128) if Dp % t == 0]
    td = max(candidates)
    if Dp // td < 2:
        two_tile = [t for t in candidates if Dp // t >= 2]
        if two_tile:
            td = max(two_tile)
    return td


def init_projection_params(weight, bias):
    """One-time init: transpose torch-layout (D, P) weight and pad D to 128."""
    D, P = weight.shape
    Dp = _round_up(D, 128)
    w = jnp.zeros((P, Dp), jnp.float32).at[:, :D].set(weight.T.astype(jnp.float32))
    b = jnp.zeros((1, Dp), jnp.float32).at[0, :D].set(bias.astype(jnp.float32))
    return w, b


@partial(jax.jit, static_argnames=("patch_size", "embed_dim"))
def architecture_forward(images, w_padded, b_padded, *, patch_size, embed_dim):
    """images: (B, C, H, W) f32; w_padded: (P, Dp); b_padded: (1, Dp) -> (B, D)."""
    B, C, H, W = images.shape
    P, Dp = w_padded.shape
    ph = pw = patch_size
    nh, nw = H // ph, W // pw
    assert H == nh * ph and W == nw * pw and P == C * ph * pw

    # Patch-position mean straight from the NCHW image: pure strided reduction,
    # feature order (c, ph, pw) already matches the torch rearrange.
    pooled = (images.astype(jnp.float32)
              .reshape(B, C, nh, ph, nw, pw)
              .mean(axis=(2, 4))
              .reshape(B, P))

    # Batch padded to a multiple of 8 only (dense sublane stores); K untouched.
    Bp = _round_up(B, 8)
    TB = _pick_batch_tile(Bp)
    TD = _pick_embed_tile(Dp)
    x = pooled if Bp == B else jnp.zeros((Bp, P), jnp.float32).at[:B].set(pooled)

    # D-tile axis outermost, batch innermost: the (P, TD) weight block index is
    # constant over the inner loop, so Pallas keeps it resident in VMEM.
    grid = (Dp // TD, Bp // TB)
    cost = pl.CostEstimate(
        flops=2 * Bp * P * Dp,
        transcendentals=0,
        bytes_accessed=4 * (Bp * P + P * Dp + Dp + Bp * Dp),
    )
    out = pl.pallas_call(
        _proj_bias_kernel,
        out_shape=jax.ShapeDtypeStruct((Bp, Dp), jnp.float32),
        grid_spec=pl.GridSpec(
            grid=grid,
            in_specs=[
                pl.BlockSpec((TB, P), lambda j, i: (i, 0)),
                pl.BlockSpec((P, TD), lambda j, i: (0, j)),
                pl.BlockSpec((1, TD), lambda j, i: (0, j)),
            ],
            out_specs=pl.BlockSpec((TB, TD), lambda j, i: (i, j)),
        ),
        compiler_params=pltpu.CompilerParams(
            dimension_semantics=("parallel", "parallel")),
        cost_estimate=cost,
    )(x, w_padded, b_padded)

    return out[:B, :embed_dim]


if __name__ == "__main__":
    # Small shapes consistent with the module: patch_size=4, channels=3,
    # embed_dim=128, images 2x3x16x16  ->  N=16 patches of dim P=48.
    patch_size = 4
    channels = 3
    embed_dim = 128
    B, H, W = 2, 16, 16
    P = channels * patch_size * patch_size

    key = jax.random.PRNGKey(0)
    k_img, k_w, k_b = jax.random.split(key, 3)

    images = jax.random.normal(k_img, (B, channels, H, W), dtype=jnp.float32)

    # Deterministic nn.Linear-style init: U(-1/sqrt(P), 1/sqrt(P))
    bound = 1.0 / (P ** 0.5)
    weight = jax.random.uniform(k_w, (embed_dim, P), jnp.float32, -bound, bound)
    bias = jax.random.uniform(k_b, (embed_dim,), jnp.float32, -bound, bound)

    # Hoisted once (model init), not per forward call.
    w_padded, b_padded = init_projection_params(weight, bias)

    out = architecture_forward(images, w_padded, b_padded,
                               patch_size=patch_size, embed_dim=embed_dim)
    out = jax.block_until_ready(out)

    # Pure-JAX reference: original rearrange -> Linear -> mean path.
    nh, nw = H // patch_size, W // patch_size
    patches = images.reshape(B, channels, nh, patch_size, nw, patch_size)
    patches = patches.transpose(0, 2, 4, 1, 3, 5).reshape(B, nh * nw, P)
    ref = jnp.mean(patches @ weight.T + bias, axis=1)

    assert out.shape == (B, embed_dim)
    assert jnp.allclose(out, ref, atol=1e-5, rtol=1e-5), float(
        jnp.max(jnp.abs(out - ref)))

    print("KERNEL_OK")
</pallas_src>

<mosaic_0001>
module attributes {stable_mosaic.version = 11 : i64} {
  func.func @_proj_bias_kernel(%arg0: i32, %arg1: i32, %arg2: memref<8x48xf32, #tpu.memory_space<vmem>>, %arg3: memref<48x128xf32, #tpu.memory_space<vmem>>, %arg4: memref<1x128xf32, #tpu.memory_space<vmem>>, %arg5: memref<8x128xf32, #tpu.memory_space<vmem>>) attributes {dimension_semantics = [#tpu.dimension_semantics<parallel>, #tpu.dimension_semantics<parallel>], iteration_bounds = array<i64: 1, 1>, scalar_prefetch = 0 : i64, scratch_operands = 0 : i64, tpu.core_type = #tpu.core_type<tc>, window_params = [{transform_indices = @transform_0, window_bounds = array<i64: 8, 48>}, {transform_indices = @transform_1, window_bounds = array<i64: 48, 128>}, {transform_indices = @transform_2, window_bounds = array<i64: 1, 128>}, {transform_indices = @transform_3, window_bounds = array<i64: 8, 128>}]} {
    %c0 = arith.constant 0 : index
    %c0_0 = arith.constant 0 : index
    %0 = vector.load %arg2[%c0, %c0_0] : memref<8x48xf32, #tpu.memory_space<vmem>>, vector<8x48xf32>
    %c0_1 = arith.constant 0 : index
    %c0_2 = arith.constant 0 : index
    %1 = vector.load %arg3[%c0_1, %c0_2] : memref<48x128xf32, #tpu.memory_space<vmem>>, vector<48x128xf32>
    %cst = arith.constant dense<0.000000e+00> : vector<8x128xf32>
    %2 = tpu.matmul %0, %1, %cst {dimension_numbers = #tpu.dot_dimension_numbers<[1], [0], [0], [1], [0, 0, 1, 1], [], []>} : vector<8x48xf32>, vector<48x128xf32>, vector<8x128xf32> -> vector<8x128xf32>
    %c0_3 = arith.constant 0 : index
    %c0_4 = arith.constant 0 : index
    %3 = vector.load %arg4[%c0_3, %c0_4] : memref<1x128xf32, #tpu.memory_space<vmem>>, vector<1x128xf32>
    %4 = vector.broadcast %3 : vector<1x128xf32> to vector<8x128xf32>
    %5 = arith.addf %2, %4 : vector<8x128xf32>
    %c0_5 = arith.constant 0 : index
    %c0_6 = arith.constant 0 : index
    %6 = vector.load %arg5[%c0_5, %c0_6] : memref<8x128xf32, #tpu.memory_space<vmem>>, vector<8x128xf32>
    tpu.vector_store %arg5[%c0_5, %c0_6], %5 {strides = array<i32>} : memref<8x128xf32, #tpu.memory_space<vmem>>, vector<8x128xf32>,
    return
  }
  func.func @transform_0(%arg0: i32, %arg1: i32) -> (i32, i32) {
    %c0_i32 = arith.constant 0 : i32
    %c0_i32_0 = arith.constant 0 : i32
    return %arg1, %c0_i32 : i32, i32
  }
  func.func @transform_1(%arg0: i32, %arg1: i32) -> (i32, i32) {
    %c0_i32 = arith.constant 0 : i32
    %c0_i32_0 = arith.constant 0 : i32
    return %c0_i32, %arg0 : i32, i32
  }
  func.func @transform_2(%arg0: i32, %arg1: i32) -> (i32, i32) {
    %c0_i32 = arith.constant 0 : i32
    %c0_i32_0 = arith.constant 0 : i32
    return %c0_i32, %arg0 : i32, i32
  }
  func.func @transform_3(%arg0: i32, %arg1: i32) -> (i32, i32) {
    %c0_i32 = arith.constant 0 : i32
    return %arg1, %arg0 : i32, i32
  }
}

</mosaic_0001>

<bundles_post_ra>
// kernel: architecture_forward.1
= control target key start
LH: loop header
LB: loop body
LE: loop exit
PB: predicated region body
PF: predicated region fallthrough
CT: control target
= control target key end

     0   :  { %v143_v0 = vmov 0.0|0.0   ;;  %vm144_vm0 = vmmov 0   ;;  %v145_v4 = vmov 0.0   ;;  %vm28_vm1 = vcmask 392192   ;;  %s193_s1 = inlined_call_operand.vmem [shape: f32[48,128], index: 1, kind: input, shape index: {}]   ;;  %s194_s0 = inlined_call_operand.vmem [shape: f32[8,48], index: 0, kind: input, shape index: {}]   ;;  %s195_s2 = inlined_call_operand.vmem [shape: f32[1,128], index: 2, kind: input, shape index: {}]   ;;  %s196_s3 = inlined_call_operand.vmem [shape: f32[8,128], index: 3, kind: output, shape index: {}]  }
   0x1   :  { %131 = vmatprep.subr.bf16.mxu0 %v143_v0  ;;  %v15_v1 = vld [vmem:[%s193_s1] sm:$0xff]  ;;  %v16_v2 = vld [vmem:[%s193_s1 + $0x8] sm:$0xff]  ;;  %v17_v3 = vld [vmem:[%s193_s1 + $0x10] sm:$0xff]  ;;  %128 = vmatprep.mubr.msk.f32.mxu0 %vm144_vm0, %v145_v4 }
   0x2   :  { %v132_v5 = vpack.c.bf16 %v16_v2, %v15_v1  ;;  %v18_v6 = vld [vmem:[%s193_s1 + $0x18] sm:$0xff]  ;;  %v19_v8 = vld [vmem:[%s193_s1 + $0x20] sm:$0xff]  ;;  %v20_v9 = vld [vmem:[%s193_s1 + $0x28] sm:$0xff] }
   0x3   :  { %v135_v7 = vpack.c.bf16 %v18_v6, %v17_v3  ;;  %v138_v10 = vpack.c.bf16 %v20_v9, %v19_v8  ;;  %v14_v11 = vld [vmem:[%s194_s0] sm:$0xff] }
   0x4   :  { %133 = vmatpush3.bf16.msra.mxu0 %v132_v5  ;;  %v107_v12 = vld [vmem:[%s195_s2] ss:$0 sm:$0xff] }
   0x5   :  { %134 = vmatprep.subr.bf16.mxu0 %v143_v0 }
   0x8   :  { %136 = vmatpush3.bf16.msra.mxu0 %v135_v7 }
   0x9   :  { %137 = vmatprep.subr.bf16.mxu0 %v143_v0 }
   0xc   :  { %139 = vmatpush3.bf16.msra.mxu0 %v138_v10 }
   0xf   :  { %129 = vmatmul.mubr.msk.f32.vlgmr.msra.gmra.mrb[0].mxu0 %vm28_vm1, %v14_v11 }
  0xe2   :  { %v98_v13 = vpop.f32.mrb[0].mxu0 }
  0xe3   :  { %v99_v14 = vadd.f32 %v107_v12, %v98_v13  ;;  %v130_v15 = vpop.f32.mrb[1].mxu0 }
  0xe5   :  { %102 = vst [vmem:[%s196_s3] sm:$0xff] %v99_v14 }

</bundles_post_ra>
